<compile_context>
chip_gen: v7x
topology: tpu7x:2x2x1
jax: 0.10.0
libtpu: 0.0.40
codegen_flags: <defaults>
</compile_context>

<pallas_src>
import functools

import jax
import jax.numpy as jnp
from jax.experimental import pallas as pl
from jax.experimental.pallas import tpu as pltpu

H1 = 21
H2 = 11
BN_EPS = 1e-5
_LANES = 128


def _round_up(a, m):
    return (a + m - 1) // m * m


# ----------------------------- kernels ---------------------------------------
# Activations live in [features, batch_tile] layout inside the kernels:
# features on sublanes, the batch tile on the lane axis, so elementwise work and
# stores are lane-dense and the MXU streaming (N) dimension is the batch tile.
# Weights use PyTorch (out_features, in_features) layout, biases are column
# vectors, so each layer is y = W @ x + b.

def _encode_kernel(x_ref, w1_ref, b1_ref, w2_ref, b2_ref, w3_ref, b3_ref,
                   z_ref, stats_ref, *, n_valid, tb, enc_pad):
    x = x_ref[...]                                            # (tb, F) natural
    # h1 = W1 @ x^T : (H1,F) x (tb,F) contracted on F (trans-B pattern),
    # result is already in [features, batch] layout -> no input transpose.
    h = jax.lax.dot_general(w1_ref[...], x, (((1,), (1,)), ((), ())),
                            preferred_element_type=jnp.float32) + b1_ref[...]
    h = jnp.maximum(h, 0.0)                                   # (H1, tb)
    h = jnp.dot(w2_ref[...], h, preferred_element_type=jnp.float32) + b2_ref[...]
    h = jnp.maximum(h, 0.0)                                   # (H2, tb)
    z = jnp.dot(w3_ref[...], h, preferred_element_type=jnp.float32) + b3_ref[...]
    z_ref[...] = z                                            # (enc_pad, tb)

    # Per-tile BatchNorm partial statistics: masked sum and centered sum of
    # squares (masking covers the ragged last tile / batch padding lanes).
    i = pl.program_id(0)
    valid = jnp.minimum(n_valid - i * tb, tb)                 # >= 1 per tile
    lane = jax.lax.broadcasted_iota(jnp.int32, (enc_pad, tb), 1)
    mask = lane < valid
    zm = jnp.where(mask, z, 0.0)
    s = jnp.sum(zm, axis=1, keepdims=True)                    # (enc_pad, 1)
    tile_mean = s * (1.0 / valid.astype(jnp.float32))
    d = jnp.where(mask, z - tile_mean, 0.0)
    m2 = jnp.sum(d * d, axis=1, keepdims=True)                # (enc_pad, 1)
    stats_ref[0:enc_pad, :] = jnp.broadcast_to(s, (enc_pad, _LANES))
    stats_ref[enc_pad:2 * enc_pad, :] = jnp.broadcast_to(m2, (enc_pad, _LANES))


def _decode_kernel(z_ref, w4_ref, b4_ref, w5_ref, b5_ref, w6_ref, b6_ref,
                   o_ref):
    # BatchNorm affine + batch statistics are pre-folded into w4/b4.
    z = z_ref[...]                                            # (enc_pad, tb)
    h = jnp.dot(w4_ref[...], z, preferred_element_type=jnp.float32) + b4_ref[...]
    h = jnp.maximum(h, 0.0)                                   # (H1, tb)
    h = jnp.dot(w5_ref[...], h, preferred_element_type=jnp.float32) + b5_ref[...]
    h = jnp.maximum(h, 0.0)                                   # (H2, tb)
    y = jnp.dot(w6_ref[...], h, preferred_element_type=jnp.float32) + b6_ref[...]
    # Sigmoid in the lane-dense (F, tb) layout, then a single in-kernel XLU
    # transpose so the HBM store is the natural [batch, features] layout
    # (replaces the old XLA-level out.T that cost a full extra HBM pass).
    o_ref[...] = jax.nn.sigmoid(y).T                          # (tb, F)


# ----------------------------- wrapper ----------------------------------------

def _const_spec(a):
    # Full-shape block, constant index_map: DMA'd once, resident in VMEM.
    # (pl.Buffered(1) would shave the dead second buffer; left at default.)
    return pl.BlockSpec(a.shape, lambda i: (0, 0))


@functools.partial(jax.jit, static_argnames=("block_cols",))
def autoencoder_forward(x, params, *, block_cols=16384):
    """x: [batch, in_shape] float32 -> [batch, in_shape] float32."""
    (w1, b1, w2, b2, w3, b3, gamma, beta, w4, b4, w5, b5, w6, b6) = params
    n_valid, f = x.shape
    enc = w3.shape[0]
    enc_pad = max(8, _round_up(enc, 8))
    stat_rows = 2 * enc_pad
    assert block_cols >= _LANES and block_cols % _LANES == 0

    # Batch-tile (lane) width: as large as block_cols allows, but split into at
    # least 2 tiles when possible so the "parallel" batch axis can be sharded
    # across v7x's two TensorCores.  Tiny batches are zero-padded to one
    # 128-lane tile so every block stays (8,128)-aligned.
    if n_valid >= _LANES:
        xp = x
        tb = min(block_cols, _round_up(pl.cdiv(n_valid, 2), _LANES))
    else:
        xp = jnp.pad(x, ((0, _LANES - n_valid), (0, 0)))
        tb = _LANES
    n = xp.shape[0]
    grid = (pl.cdiv(n, tb),)
    num_tiles = grid[0]
    cparams = pltpu.CompilerParams(dimension_semantics=("parallel",))

    # Zero-pad the encoder head to enc_pad rows so z is a full-sublane tile.
    w3p = jnp.zeros((enc_pad, H2), jnp.float32).at[:enc].set(w3)
    b3p = jnp.zeros((enc_pad, 1), jnp.float32).at[:enc, 0].set(b3)
    b1c, b2c = b1[:, None], b2[:, None]

    enc_kernel = functools.partial(_encode_kernel, n_valid=n_valid, tb=tb,
                                   enc_pad=enc_pad)

    # ---- pass 1: tiled encoder (also emits per-tile BN partial statistics) --
    z_t, stats = pl.pallas_call(
        enc_kernel,
        out_shape=(jax.ShapeDtypeStruct((enc_pad, n), jnp.float32),
                   jax.ShapeDtypeStruct((stat_rows * num_tiles, _LANES),
                                        jnp.float32)),
        grid=grid,
        in_specs=[
            pl.BlockSpec((tb, f), lambda i: (i, 0)),
            _const_spec(w1), _const_spec(b1c),
            _const_spec(w2), _const_spec(b2c),
            _const_spec(w3p), _const_spec(b3p),
        ],
        out_specs=(pl.BlockSpec((enc_pad, tb), lambda i: (0, i)),
                   pl.BlockSpec((stat_rows, _LANES), lambda i: (i, 0))),
        compiler_params=cparams,
    )(xp, w1, b1c, w2, b2c, w3p, b3p)

    # ---- BatchNorm1d: training-mode batch statistics over the FULL batch ----
    # Combine the per-tile (sum, centered-M2) pairs with the Chan/Welford
    # parallel formula (avoids E[z^2]-mean^2 cancellation); only tiny (T, enc)
    # arrays are touched here, z itself is never re-read from HBM.
    counts = [min(tb, n_valid - i * tb) for i in range(num_tiles)]
    counts_f = jnp.asarray(counts, jnp.float32)[:, None]              # (T, 1)
    st = stats.reshape(num_tiles, stat_rows, _LANES)[:, :, 0]         # (T, 2*ep)
    sums = st[:, :enc]                                                # (T, enc)
    m2s = st[:, enc_pad:enc_pad + enc]                                # (T, enc)
    mean = jnp.sum(sums, axis=0) / n_valid                            # (enc,)
    tile_means = sums / counts_f
    m2 = jnp.sum(m2s, axis=0) + jnp.sum(counts_f * (tile_means - mean) ** 2,
                                        axis=0)
    var = m2 / n_valid                                                # biased
    scale = gamma / jnp.sqrt(var + BN_EPS)                            # (enc,)
    shift = beta - mean * scale                                       # (enc,)
    # Fold BN into the first decoder Linear: W4 (scale*z + shift) + b4.
    w4_eff = jnp.zeros((H1, enc_pad), jnp.float32).at[:, :enc].set(
        w4 * scale[None, :])
    b4_eff = (b4 + w4 @ shift)[:, None]
    b5c, b6c = b5[:, None], b6[:, None]

    # ---- pass 2: tiled decoder ----------------------------------------------
    out = pl.pallas_call(
        _decode_kernel,
        out_shape=jax.ShapeDtypeStruct((n, f), jnp.float32),
        grid=grid,
        in_specs=[
            pl.BlockSpec((enc_pad, tb), lambda i: (0, i)),
            _const_spec(w4_eff), _const_spec(b4_eff),
            _const_spec(w5), _const_spec(b5c),
            _const_spec(w6), _const_spec(b6c),
        ],
        out_specs=pl.BlockSpec((tb, f), lambda i: (i, 0)),
        compiler_params=cparams,
    )(z_t, w4_eff, b4_eff, w5, b5c, w6, b6c)

    return out[:n_valid]


# ----------------------------- params & reference -----------------------------

def init_params(key, in_shape, enc_shape):
    """PyTorch-style init: W,b ~ U(-1/sqrt(fan_in), +1/sqrt(fan_in)).
    Weights are stored in PyTorch (out_features, in_features) layout."""
    def linear(key, fan_in, fan_out):
        kw, kb = jax.random.split(key)
        bound = 1.0 / (float(fan_in) ** 0.5)
        w = jax.random.uniform(kw, (fan_out, fan_in), jnp.float32, -bound, bound)
        b = jax.random.uniform(kb, (fan_out,), jnp.float32, -bound, bound)
        return w, b

    keys = jax.random.split(key, 6)
    w1, b1 = linear(keys[0], in_shape, H1)
    w2, b2 = linear(keys[1], H1, H2)
    w3, b3 = linear(keys[2], H2, enc_shape)
    gamma = jnp.ones((enc_shape,), jnp.float32)
    beta = jnp.zeros((enc_shape,), jnp.float32)
    w4, b4 = linear(keys[3], enc_shape, H1)
    w5, b5 = linear(keys[4], H1, H2)
    w6, b6 = linear(keys[5], H2, in_shape)
    return (w1, b1, w2, b2, w3, b3, gamma, beta, w4, b4, w5, b5, w6, b6)


def autoencoder_reference(x, params):
    (w1, b1, w2, b2, w3, b3, gamma, beta, w4, b4, w5, b5, w6, b6) = params
    h = jnp.maximum(x @ w1.T + b1, 0.0)
    h = jnp.maximum(h @ w2.T + b2, 0.0)
    z = h @ w3.T + b3
    mean = jnp.mean(z, axis=0)
    var = jnp.mean((z - mean) ** 2, axis=0)              # biased (PyTorch BN)
    z = (z - mean) / jnp.sqrt(var + BN_EPS) * gamma + beta
    h = jnp.maximum(z @ w4.T + b4, 0.0)
    h = jnp.maximum(h @ w5.T + b5, 0.0)
    return jax.nn.sigmoid(h @ w6.T + b6)


# ----------------------------- demo / check -----------------------------------

if __name__ == "__main__":
    key = jax.random.PRNGKey(0)
    k_x, k_p = jax.random.split(key)

    in_shape = 16
    enc_shape = 4
    params = init_params(k_p, in_shape, enc_shape)

    # Small demo batch (mimics `df / 100.0`: small positive values).
    batch = 8
    x = jax.random.uniform(k_x, (batch, in_shape), jnp.float32) / 100.0
    out = jax.block_until_ready(autoencoder_forward(x, params))
    ref = autoencoder_reference(x, params)
    assert out.shape == (batch, in_shape)
    # BatchNorm's 1/sqrt(var + 1e-5) amplifies ulp-level MXU-vs-XLA matmul
    # reduction-order differences when batch variance ~ eps, hence 1e-4.
    assert jnp.allclose(out, ref, atol=1e-4, rtol=1e-4), \
        float(jnp.max(jnp.abs(out - ref)))

    # Multi-tile path with a ragged last tile (3 tiles of 128 for n=300);
    # exercises the masked per-tile BN stats + Chan combination.
    batch2 = 300
    x2 = jax.random.uniform(jax.random.PRNGKey(1), (batch2, in_shape),
                            jnp.float32) / 100.0
    out2 = jax.block_until_ready(
        autoencoder_forward(x2, params, block_cols=128))
    ref2 = autoencoder_reference(x2, params)
    assert out2.shape == (batch2, in_shape)
    assert jnp.allclose(out2, ref2, atol=1e-4, rtol=1e-4), \
        float(jnp.max(jnp.abs(out2 - ref2)))

    # Default tiling: auto-splits into 2 tiles (384 + ragged 216) so the
    # "parallel" batch axis can span both TensorCores on v7x.
    batch3 = 600
    x3 = jax.random.uniform(jax.random.PRNGKey(2), (batch3, in_shape),
                            jnp.float32) / 100.0
    out3 = jax.block_until_ready(autoencoder_forward(x3, params))
    ref3 = autoencoder_reference(x3, params)
    assert out3.shape == (batch3, in_shape)
    assert jnp.allclose(out3, ref3, atol=1e-4, rtol=1e-4), \
        float(jnp.max(jnp.abs(out3 - ref3)))

    print("KERNEL_OK")
</pallas_src>

<mosaic_0001>
module attributes {stable_mosaic.version = 11 : i64} {
  func.func @_encode_kernel(%arg0: i32, %arg1: memref<128x16xf32, #tpu.memory_space<vmem>>, %arg2: memref<21x16xf32, #tpu.memory_space<vmem>>, %arg3: memref<21x1xf32, #tpu.memory_space<vmem>>, %arg4: memref<11x21xf32, #tpu.memory_space<vmem>>, %arg5: memref<11x1xf32, #tpu.memory_space<vmem>>, %arg6: memref<8x11xf32, #tpu.memory_space<vmem>>, %arg7: memref<8x1xf32, #tpu.memory_space<vmem>>, %arg8: memref<8x128xf32, #tpu.memory_space<vmem>>, %arg9: memref<16x128xf32, #tpu.memory_space<vmem>>) attributes {dimension_semantics = [#tpu.dimension_semantics<parallel>], iteration_bounds = array<i64: 1>, scalar_prefetch = 0 : i64, scratch_operands = 0 : i64, tpu.core_type = #tpu.core_type<tc>, window_params = [{transform_indices = @transform_0, window_bounds = array<i64: 128, 16>}, {pipeline_mode = #tpu.pipeline_mode<synchronous>, transform_indices = @transform_1, window_bounds = array<i64: 21, 16>}, {pipeline_mode = #tpu.pipeline_mode<synchronous>, transform_indices = @transform_2, window_bounds = array<i64: 21, 1>}, {pipeline_mode = #tpu.pipeline_mode<synchronous>, transform_indices = @transform_3, window_bounds = array<i64: 11, 21>}, {pipeline_mode = #tpu.pipeline_mode<synchronous>, transform_indices = @transform_4, window_bounds = array<i64: 11, 1>}, {pipeline_mode = #tpu.pipeline_mode<synchronous>, transform_indices = @transform_5, window_bounds = array<i64: 8, 11>}, {pipeline_mode = #tpu.pipeline_mode<synchronous>, transform_indices = @transform_6, window_bounds = array<i64: 8, 1>}, {transform_indices = @transform_7, window_bounds = array<i64: 8, 128>}, {transform_indices = @transform_8, window_bounds = array<i64: 16, 128>}]} {
    %c0 = arith.constant 0 : index
    %c0_0 = arith.constant 0 : index
    %0 = vector.load %arg1[%c0, %c0_0] : memref<128x16xf32, #tpu.memory_space<vmem>>, vector<128x16xf32>
    %c0_1 = arith.constant 0 : index
    %c0_2 = arith.constant 0 : index
    %1 = vector.load %arg2[%c0_1, %c0_2] : memref<21x16xf32, #tpu.memory_space<vmem>>, vector<21x16xf32>
    %cst = arith.constant dense<0.000000e+00> : vector<21x128xf32>
    %2 = tpu.matmul %1, %0, %cst {dimension_numbers = #tpu.dot_dimension_numbers<[1], [1], [0], [0], [0, 0, 1, 0], [], []>} : vector<21x16xf32>, vector<128x16xf32>, vector<21x128xf32> -> vector<21x128xf32>
    %c0_3 = arith.constant 0 : index
    %c0_4 = arith.constant 0 : index
    %3 = vector.load %arg3[%c0_3, %c0_4] : memref<21x1xf32, #tpu.memory_space<vmem>>, vector<21x1xf32>
    %4 = vector.broadcast %3 : vector<21x1xf32> to vector<21x128xf32>
    %5 = arith.addf %2, %4 : vector<21x128xf32>
    %cst_5 = arith.constant 0.000000e+00 : f32
    %6 = vector.broadcast %cst_5 : f32 to vector<21x128xf32>
    %7 = arith.maximumf %5, %6 : vector<21x128xf32>
    %c0_6 = arith.constant 0 : index
    %c0_7 = arith.constant 0 : index
    %8 = vector.load %arg4[%c0_6, %c0_7] : memref<11x21xf32, #tpu.memory_space<vmem>>, vector<11x21xf32>
    %cst_8 = arith.constant dense<0.000000e+00> : vector<11x128xf32>
    %9 = tpu.matmul %8, %7, %cst_8 {dimension_numbers = #tpu.dot_dimension_numbers<[1], [0], [0], [1], [0, 0, 1, 1], [], []>} : vector<11x21xf32>, vector<21x128xf32>, vector<11x128xf32> -> vector<11x128xf32>
    %c0_9 = arith.constant 0 : index
    %c0_10 = arith.constant 0 : index
    %10 = vector.load %arg5[%c0_9, %c0_10] : memref<11x1xf32, #tpu.memory_space<vmem>>, vector<11x1xf32>
    %11 = vector.broadcast %10 : vector<11x1xf32> to vector<11x128xf32>
    %12 = arith.addf %9, %11 : vector<11x128xf32>
    %cst_11 = arith.constant 0.000000e+00 : f32
    %13 = vector.broadcast %cst_11 : f32 to vector<11x128xf32>
    %14 = arith.maximumf %12, %13 : vector<11x128xf32>
    %c0_12 = arith.constant 0 : index
    %c0_13 = arith.constant 0 : index
    %15 = vector.load %arg6[%c0_12, %c0_13] : memref<8x11xf32, #tpu.memory_space<vmem>>, vector<8x11xf32>
    %cst_14 = arith.constant dense<0.000000e+00> : vector<8x128xf32>
    %16 = tpu.matmul %15, %14, %cst_14 {dimension_numbers = #tpu.dot_dimension_numbers<[1], [0], [0], [1], [0, 0, 1, 1], [], []>} : vector<8x11xf32>, vector<11x128xf32>, vector<8x128xf32> -> vector<8x128xf32>
    %c0_15 = arith.constant 0 : index
    %c0_16 = arith.constant 0 : index
    %17 = vector.load %arg7[%c0_15, %c0_16] : memref<8x1xf32, #tpu.memory_space<vmem>>, vector<8x1xf32>
    %18 = vector.broadcast %17 : vector<8x1xf32> to vector<8x128xf32>
    %19 = arith.addf %16, %18 : vector<8x128xf32>
    %c0_17 = arith.constant 0 : index
    %c0_18 = arith.constant 0 : index
    %20 = vector.load %arg8[%c0_17, %c0_18] : memref<8x128xf32, #tpu.memory_space<vmem>>, vector<8x128xf32>
    tpu.vector_store %arg8[%c0_17, %c0_18], %19 {strides = array<i32>} : memref<8x128xf32, #tpu.memory_space<vmem>>, vector<8x128xf32>,
    %c128_i32 = arith.constant 128 : i32
    %21 = arith.muli %arg0, %c128_i32 : i32
    %c8_i32 = arith.constant 8 : i32
    %22 = arith.subi %c8_i32, %21 : i32
    %c128_i32_19 = arith.constant 128 : i32
    %23 = arith.minsi %22, %c128_i32_19 : i32
    %24 = tpu.iota {dimensions = array<i32: 1>} : vector<8x128xi32>
    %25 = vector.broadcast %23 : i32 to vector<8x128xi32>
    %26 = arith.cmpi slt, %24, %25 : vector<8x128xi32>
    %cst_20 = arith.constant 0.000000e+00 : f32
    %27 = vector.broadcast %cst_20 : f32 to vector<8x128xf32>
    %28 = arith.select %26, %19, %27 : vector<8x128xi1>, vector<8x128xf32>
    %cst_21 = arith.constant dense<0.000000e+00> : vector<8xf32>
    %29 = vector.multi_reduction <add>, %28, %cst_21 [1] : vector<8x128xf32> to vector<8xf32>
    %30 = vector.shape_cast %29 : vector<8xf32> to vector<8x1xf32>
    %31 = arith.sitofp %23 : i32 to f32
    %cst_22 = arith.constant 1.000000e+00 : f32
    %32 = arith.divf %cst_22, %31 : f32
    %33 = vector.broadcast %32 : f32 to vector<8x1xf32>
    %34 = arith.mulf %30, %33 : vector<8x1xf32>
    %35 = vector.broadcast %34 : vector<8x1xf32> to vector<8x128xf32>
    %36 = arith.subf %19, %35 : vector<8x128xf32>
    %cst_23 = arith.constant 0.000000e+00 : f32
    %37 = vector.broadcast %cst_23 : f32 to vector<8x128xf32>
    %38 = arith.select %26, %36, %37 : vector<8x128xi1>, vector<8x128xf32>
    %39 = arith.mulf %38, %38 : vector<8x128xf32>
    %cst_24 = arith.constant dense<0.000000e+00> : vector<8xf32>
    %40 = vector.multi_reduction <add>, %39, %cst_24 [1] : vector<8x128xf32> to vector<8xf32>
    %41 = vector.shape_cast %40 : vector<8xf32> to vector<8x1xf32>
    %42 = vector.shape_cast %30 : vector<8x1xf32> to vector<8x1xf32>
    %43 = vector.broadcast %42 : vector<8x1xf32> to vector<8x128xf32>
    %c0_25 = arith.constant 0 : index
    %c0_26 = arith.constant 0 : index
    %44 = vector.load %arg9[%c0_25, %c0_26] : memref<16x128xf32, #tpu.memory_space<vmem>>, vector<8x128xf32>
    tpu.vector_store %arg9[%c0_25, %c0_26], %43 {strides = array<i32>} : memref<16x128xf32, #tpu.memory_space<vmem>>, vector<8x128xf32>,
    %45 = vector.shape_cast %41 : vector<8x1xf32> to vector<8x1xf32>
    %46 = vector.broadcast %45 : vector<8x1xf32> to vector<8x128xf32>
    %c8 = arith.constant 8 : index
    %c0_27 = arith.constant 0 : index
    %47 = vector.load %arg9[%c8, %c0_27] : memref<16x128xf32, #tpu.memory_space<vmem>>, vector<8x128xf32>
    tpu.vector_store %arg9[%c8, %c0_27], %46 {strides = array<i32>} : memref<16x128xf32, #tpu.memory_space<vmem>>, vector<8x128xf32>,
    return
  }
  func.func @transform_0(%arg0: i32) -> (i32, i32) {
    %c0_i32 = arith.constant 0 : i32
    %c0_i32_0 = arith.constant 0 : i32
    return %arg0, %c0_i32 : i32, i32
  }
  func.func @transform_1(%arg0: i32) -> (i32, i32) {
    %c0_i32 = arith.constant 0 : i32
    %c0_i32_0 = arith.constant 0 : i32
    %c0_i32_1 = arith.constant 0 : i32
    return %c0_i32, %c0_i32_0 : i32, i32
  }
  func.func @transform_2(%arg0: i32) -> (i32, i32) {
    %c0_i32 = arith.constant 0 : i32
    %c0_i32_0 = arith.constant 0 : i32
    %c0_i32_1 = arith.constant 0 : i32
    return %c0_i32, %c0_i32_0 : i32, i32
  }
  func.func @transform_3(%arg0: i32) -> (i32, i32) {
    %c0_i32 = arith.constant 0 : i32
    %c0_i32_0 = arith.constant 0 : i32
    %c0_i32_1 = arith.constant 0 : i32
    return %c0_i32, %c0_i32_0 : i32, i32
  }
  func.func @transform_4(%arg0: i32) -> (i32, i32) {
    %c0_i32 = arith.constant 0 : i32
    %c0_i32_0 = arith.constant 0 : i32
    %c0_i32_1 = arith.constant 0 : i32
    return %c0_i32, %c0_i32_0 : i32, i32
  }
  func.func @transform_5(%arg0: i32) -> (i32, i32) {
    %c0_i32 = arith.constant 0 : i32
    %c0_i32_0 = arith.constant 0 : i32
    %c0_i32_1 = arith.constant 0 : i32
    return %c0_i32, %c0_i32_0 : i32, i32
  }
  func.func @transform_6(%arg0: i32) -> (i32, i32) {
    %c0_i32 = arith.constant 0 : i32
    %c0_i32_0 = arith.constant 0 : i32
    %c0_i32_1 = arith.constant 0 : i32
    return %c0_i32, %c0_i32_0 : i32, i32
  }
  func.func @transform_7(%arg0: i32) -> (i32, i32) {
    %c0_i32 = arith.constant 0 : i32
    %c0_i32_0 = arith.constant 0 : i32
    return %c0_i32, %arg0 : i32, i32
  }
  func.func @transform_8(%arg0: i32) -> (i32, i32) {
    %c0_i32 = arith.constant 0 : i32
    %c0_i32_0 = arith.constant 0 : i32
    return %arg0, %c0_i32 : i32, i32
  }
}

module attributes {stable_mosaic.version = 11 : i64} {
  func.func @_decode_kernel(%arg0: i32, %arg1: memref<8x128xf32, #tpu.memory_space<vmem>>, %arg2: memref<21x8xf32, #tpu.memory_space<vmem>>, %arg3: memref<21x1xf32, #tpu.memory_space<vmem>>, %arg4: memref<11x21xf32, #tpu.memory_space<vmem>>, %arg5: memref<11x1xf32, #tpu.memory_space<vmem>>, %arg6: memref<16x11xf32, #tpu.memory_space<vmem>>, %arg7: memref<16x1xf32, #tpu.memory_space<vmem>>, %arg8: memref<128x16xf32, #tpu.memory_space<vmem>>) attributes {dimension_semantics = [#tpu.dimension_semantics<parallel>], iteration_bounds = array<i64: 1>, scalar_prefetch = 0 : i64, scratch_operands = 0 : i64, tpu.core_type = #tpu.core_type<tc>, window_params = [{transform_indices = @transform_0, window_bounds = array<i64: 8, 128>}, {pipeline_mode = #tpu.pipeline_mode<synchronous>, transform_indices = @transform_1, window_bounds = array<i64: 21, 8>}, {pipeline_mode = #tpu.pipeline_mode<synchronous>, transform_indices = @transform_2, window_bounds = array<i64: 21, 1>}, {pipeline_mode = #tpu.pipeline_mode<synchronous>, transform_indices = @transform_3, window_bounds = array<i64: 11, 21>}, {pipeline_mode = #tpu.pipeline_mode<synchronous>, transform_indices = @transform_4, window_bounds = array<i64: 11, 1>}, {pipeline_mode = #tpu.pipeline_mode<synchronous>, transform_indices = @transform_5, window_bounds = array<i64: 16, 11>}, {pipeline_mode = #tpu.pipeline_mode<synchronous>, transform_indices = @transform_6, window_bounds = array<i64: 16, 1>}, {transform_indices = @transform_7, window_bounds = array<i64: 128, 16>}]} {
    %c0 = arith.constant 0 : index
    %c0_0 = arith.constant 0 : index
    %0 = vector.load %arg1[%c0, %c0_0] : memref<8x128xf32, #tpu.memory_space<vmem>>, vector<8x128xf32>
    %c0_1 = arith.constant 0 : index
    %c0_2 = arith.constant 0 : index
    %1 = vector.load %arg2[%c0_1, %c0_2] : memref<21x8xf32, #tpu.memory_space<vmem>>, vector<21x8xf32>
    %cst = arith.constant dense<0.000000e+00> : vector<21x128xf32>
    %2 = tpu.matmul %1, %0, %cst {dimension_numbers = #tpu.dot_dimension_numbers<[1], [0], [0], [1], [0, 0, 1, 1], [], []>} : vector<21x8xf32>, vector<8x128xf32>, vector<21x128xf32> -> vector<21x128xf32>
    %c0_3 = arith.constant 0 : index
    %c0_4 = arith.constant 0 : index
    %3 = vector.load %arg3[%c0_3, %c0_4] : memref<21x1xf32, #tpu.memory_space<vmem>>, vector<21x1xf32>
    %4 = vector.broadcast %3 : vector<21x1xf32> to vector<21x128xf32>
    %5 = arith.addf %2, %4 : vector<21x128xf32>
    %cst_5 = arith.constant 0.000000e+00 : f32
    %6 = vector.broadcast %cst_5 : f32 to vector<21x128xf32>
    %7 = arith.maximumf %5, %6 : vector<21x128xf32>
    %c0_6 = arith.constant 0 : index
    %c0_7 = arith.constant 0 : index
    %8 = vector.load %arg4[%c0_6, %c0_7] : memref<11x21xf32, #tpu.memory_space<vmem>>, vector<11x21xf32>
    %cst_8 = arith.constant dense<0.000000e+00> : vector<11x128xf32>
    %9 = tpu.matmul %8, %7, %cst_8 {dimension_numbers = #tpu.dot_dimension_numbers<[1], [0], [0], [1], [0, 0, 1, 1], [], []>} : vector<11x21xf32>, vector<21x128xf32>, vector<11x128xf32> -> vector<11x128xf32>
    %c0_9 = arith.constant 0 : index
    %c0_10 = arith.constant 0 : index
    %10 = vector.load %arg5[%c0_9, %c0_10] : memref<11x1xf32, #tpu.memory_space<vmem>>, vector<11x1xf32>
    %11 = vector.broadcast %10 : vector<11x1xf32> to vector<11x128xf32>
    %12 = arith.addf %9, %11 : vector<11x128xf32>
    %cst_11 = arith.constant 0.000000e+00 : f32
    %13 = vector.broadcast %cst_11 : f32 to vector<11x128xf32>
    %14 = arith.maximumf %12, %13 : vector<11x128xf32>
    %c0_12 = arith.constant 0 : index
    %c0_13 = arith.constant 0 : index
    %15 = vector.load %arg6[%c0_12, %c0_13] : memref<16x11xf32, #tpu.memory_space<vmem>>, vector<16x11xf32>
    %cst_14 = arith.constant dense<0.000000e+00> : vector<16x128xf32>
    %16 = tpu.matmul %15, %14, %cst_14 {dimension_numbers = #tpu.dot_dimension_numbers<[1], [0], [0], [1], [0, 0, 1, 1], [], []>} : vector<16x11xf32>, vector<11x128xf32>, vector<16x128xf32> -> vector<16x128xf32>
    %c0_15 = arith.constant 0 : index
    %c0_16 = arith.constant 0 : index
    %17 = vector.load %arg7[%c0_15, %c0_16] : memref<16x1xf32, #tpu.memory_space<vmem>>, vector<16x1xf32>
    %18 = vector.broadcast %17 : vector<16x1xf32> to vector<16x128xf32>
    %19 = arith.addf %16, %18 : vector<16x128xf32>
    %20 = arith.negf %19 : vector<16x128xf32>
    %21 = math.exp %20 : vector<16x128xf32>
    %cst_17 = arith.constant 1.000000e+00 : f32
    %22 = vector.broadcast %cst_17 : f32 to vector<16x128xf32>
    %23 = arith.addf %22, %21 : vector<16x128xf32>
    %24 = arith.divf %22, %23 : vector<16x128xf32>
    %25 = tpu.transpose %24, [1, 0] : vector<16x128xf32> -> vector<128x16xf32>
    %c0_18 = arith.constant 0 : index
    %c0_19 = arith.constant 0 : index
    %26 = vector.load %arg8[%c0_18, %c0_19] : memref<128x16xf32, #tpu.memory_space<vmem>>, vector<128x16xf32>
    tpu.vector_store %arg8[%c0_18, %c0_19], %25 {strides = array<i32>} : memref<128x16xf32, #tpu.memory_space<vmem>>, vector<128x16xf32>,
    return
  }
  func.func @transform_0(%arg0: i32) -> (i32, i32) {
    %c0_i32 = arith.constant 0 : i32
    %c0_i32_0 = arith.constant 0 : i32
    return %c0_i32, %arg0 : i32, i32
  }
  func.func @transform_1(%arg0: i32) -> (i32, i32) {
    %c0_i32 = arith.constant 0 : i32
    %c0_i32_0 = arith.constant 0 : i32
    %c0_i32_1 = arith.constant 0 : i32
    return %c0_i32, %c0_i32_0 : i32, i32
  }
  func.func @transform_2(%arg0: i32) -> (i32, i32) {
    %c0_i32 = arith.constant 0 : i32
    %c0_i32_0 = arith.constant 0 : i32
    %c0_i32_1 = arith.constant 0 : i32
    return %c0_i32, %c0_i32_0 : i32, i32
  }
  func.func @transform_3(%arg0: i32) -> (i32, i32) {
    %c0_i32 = arith.constant 0 : i32
    %c0_i32_0 = arith.constant 0 : i32
    %c0_i32_1 = arith.constant 0 : i32
    return %c0_i32, %c0_i32_0 : i32, i32
  }
  func.func @transform_4(%arg0: i32) -> (i32, i32) {
    %c0_i32 = arith.constant 0 : i32
    %c0_i32_0 = arith.constant 0 : i32
    %c0_i32_1 = arith.constant 0 : i32
    return %c0_i32, %c0_i32_0 : i32, i32
  }
  func.func @transform_5(%arg0: i32) -> (i32, i32) {
    %c0_i32 = arith.constant 0 : i32
    %c0_i32_0 = arith.constant 0 : i32
    %c0_i32_1 = arith.constant 0 : i32
    return %c0_i32, %c0_i32_0 : i32, i32
  }
  func.func @transform_6(%arg0: i32) -> (i32, i32) {
    %c0_i32 = arith.constant 0 : i32
    %c0_i32_0 = arith.constant 0 : i32
    %c0_i32_1 = arith.constant 0 : i32
    return %c0_i32, %c0_i32_0 : i32, i32
  }
  func.func @transform_7(%arg0: i32) -> (i32, i32) {
    %c0_i32 = arith.constant 0 : i32
    %c0_i32_0 = arith.constant 0 : i32
    return %arg0, %c0_i32 : i32, i32
  }
}

</mosaic_0001>

<bundles_post_ra>
// kernel: autoencoder_forward.2
= control target key start
LH: loop header
LB: loop body
LE: loop exit
PB: predicated region body
PF: predicated region fallthrough
CT: control target
= control target key end

     0   :  { %vm65_vm0 = vcmask 130048   ;;  %v581_v0 = vmov 0.0|0.0   ;;  %vm582_vm2 = vmmov 0   ;;  %v583_v4 = vmov 0.0   ;;  %s768_s0 = inlined_call_operand.vmem [shape: f32[128,16], index: 0, kind: input, shape index: {}]   ;;  %s769_s2 = inlined_call_operand.vmem [shape: f32[21,1], index: 2, kind: input, shape index: {}]   ;;  %s770_s4 = inlined_call_operand.vmem [shape: f32[11,1], index: 4, kind: input, shape index: {}]   ;;  %s771_s6 = inlined_call_operand.vmem [shape: f32[8,1], index: 6, kind: input, shape index: {}]   ;;  %s772_s1 = inlined_call_operand.vmem [shape: f32[21,16], index: 1, kind: input, shape index: {}]   ;;  %s773_s3 = inlined_call_operand.vmem [shape: f32[11,21], index: 3, kind: input, shape index: {}]   ;;  %s774_s5 = inlined_call_operand.vmem [shape: f32[8,11], index: 5, kind: input, shape index: {}]   ;;  %s775_s7 = inlined_call_operand.vmem [shape: f32[8,128], index: 7, kind: output, shape index: {0}]   ;;  %s776_s8 = inlined_call_operand.vmem [shape: f32[16,128], index: 8, kind: output, shape index: {1}]  }
   0x1   :  { %534 = vmatprep.subr.bf16.mxu0 %v581_v0  ;;  %v28_v1 = vld [vmem:[%s768_s0] sm:$0xff]  ;;  %v29_v2 = vld [vmem:[%s768_s0 + $0x8] sm:$0xff]  ;;  %vm640_vm1 = vmpackc.low %vm65_vm0, %vm65_vm0  ;;  %509 = vmatprep.mubr.msk.f32.mxu0 %vm582_vm2, %v583_v4  ;;  %v584_v6 = vmov 0   ;;  %vm220_vm3 = vcmask 171008   ;;  %vm227_vm4 = vcmask 1044480   ;;  %vm319_vm5 = vcmask 1042432  }
   0x2   :  { %v535_v5 = vpack.c.bf16 %v29_v2, %v28_v1  ;;  %579 = vset.pattern.permute.xlu0 %v584_v6  ;;  %580 = vset.pattern.permute.xlu1 %v584_v6  ;;  %v30_v7 = vld [vmem:[%s768_s0 + $0x10] sm:$0xff]  ;;  %v31_v8 = vld [vmem:[%s768_s0 + $0x18] sm:$0xff]  ;;  %v47_v9 = vld [vmem:[%s769_s2] sm:$0xff]  ;;  %vm585_vm6 = vmmov 1   ;;  %vm315_vm8 = vcmask 89088   ;;  %v398_v1 = vlaneseq }
   0x3   :  { %v539_v10 = vpack.c.bf16 %v31_v8, %v30_v7  ;;  %52 = vperm.xlu0 %579, %v47_v9   ;;  %v49_v11 = vld [vmem:[%s769_s2 + $0x10] sm:$0x1f]  ;;  %v48_v12 = vld [vmem:[%s769_s2 + $0x8] sm:$0xff]  ;;  %v208_v13 = vld [vmem:[%s770_s4] sm:$0xff] }
   0x4   :  { %537 = vmatpush3.bf16.xpose.msk.msra.mxu0 %vm640_vm1, %v535_v5  ;;  %62 = vperm.xlu1 %580, %v49_v11   ;;  %v32_v14 = vld [vmem:[%s768_s0 + $0x20] sm:$0xff]  ;;  %v33_v15 = vld [vmem:[%s768_s0 + $0x28] sm:$0xff]  ;;  %v34_v19 = vld [vmem:[%s768_s0 + $0x30] sm:$0xff]  ;;  %v399_v2 = vand.u32 127, %v398_v1 }
   0x5   :  { %538 = vmatprep.subr.bf16.mxu0 %v581_v0  ;;  %v209_v16 = vld [vmem:[%s770_s4 + $0x8] sm:$0x7]  ;;  %v309_v17 = vld [vmem:[%s771_s6] sm:$0xff]  ;;  %v543_v18 = vpack.c.bf16 %v33_v15, %v32_v14  ;;  %v35_v20 = vld [vmem:[%s768_s0 + $0x38] sm:$0xff] }
   0x6   :  { %v547_v21 = vpack.c.bf16 %v35_v20, %v34_v19  ;;  %v36_v22 = vld [vmem:[%s768_s0 + $0x40] sm:$0xff]  ;;  %v37_v23 = vld [vmem:[%s768_s0 + $0x48] sm:$0xff]  ;;  %v38_v25 = vld [vmem:[%s768_s0 + $0x50] sm:$0xff]  ;;  %vm401_vm9 = vcmp.lt.s32.totalorder %v399_v2, 8 }
   0x7   :  { %57 = vperm.xlu0 %579, %v48_v12   ;;  %v551_v24 = vpack.c.bf16 %v37_v23, %v36_v22  ;;  %v39_v26 = vld [vmem:[%s768_s0 + $0x58] sm:$0xff]  ;;  %v40_v28 = vld [vmem:[%s768_s0 + $0x60] sm:$0xff]  ;;  %v41_v29 = vld [vmem:[%s768_s0 + $0x68] sm:$0xff] }
   0x8   :  { %212 = vperm.xlu1 %580, %v208_v13   ;;  %v555_v27 = vpack.c.bf16 %v39_v26, %v38_v25  ;;  %v559_v30 = vpack.c.bf16 %v41_v29, %v40_v28  ;;  %v42_v31 = vld [vmem:[%s768_s0 + $0x70] sm:$0xff]  ;;  %v43_v32 = vld [vmem:[%s768_s0 + $0x78] sm:$0xff]  ;;  %v44_v34 = vld [vmem:[%s772_s1] sm:$0xff] }
   0x9   :  { %v563_v33 = vpack.c.bf16 %v43_v32, %v42_v31  ;;  %v45_v35 = vld [vmem:[%s772_s1 + $0x8] sm:$0xff]  ;;  %v46_v36 = vld [vmem:[%s772_s1 + $0x10] sm:$0x1f]  ;;  %v206_v37 = vld [vmem:[%s773_s3] sm:$0xff] }
   0xa   :  { %524 = vmatprep.mubr.msk.f32.mxu1 %vm220_vm3, %v206_v37  ;;  %v207_v54 = vld [vmem:[%s773_s3 + $0x8] sm:$0x7]  ;;  %vm572_vm7 = vmpackc.low %vm319_vm5, %vm585_vm6 }
   0xb   :  { %217 = vperm.xlu0 %579, %v209_v16  }
   0xc   :  { %541 = vmatpush3.bf16.xpose.msk.msra.mxu0 %vm640_vm1, %v539_v10  ;;  %312 = vperm.xlu1 %580, %v309_v17  }
   0xd   :  { %542 = vmatprep.subr.bf16.mxu0 %v581_v0 }
  0x14   :  { %545 = vmatpush3.bf16.xpose.msk.msra.mxu0 %vm640_vm1, %v543_v18 }
  0x15   :  { %546 = vmatprep.subr.bf16.mxu0 %v581_v0 }
  0x1c   :  { %549 = vmatpush3.bf16.xpose.msk.msra.mxu0 %vm640_vm1, %v547_v21 }
  0x1d   :  { %550 = vmatprep.subr.bf16.mxu0 %v581_v0 }
  0x24   :  { %553 = vmatpush3.bf16.xpose.msk.msra.mxu0 %vm640_vm1, %v551_v24 }
  0x25   :  { %554 = vmatprep.subr.bf16.mxu0 %v581_v0 }
  0x2c   :  { %557 = vmatpush3.bf16.xpose.msk.msra.mxu0 %vm640_vm1, %v555_v27 }
  0x2d   :  { %558 = vmatprep.subr.bf16.mxu0 %v581_v0 }
  0x34   :  { %561 = vmatpush3.bf16.xpose.msk.msra.mxu0 %vm640_vm1, %v559_v30 }
  0x35   :  { %562 = vmatprep.subr.bf16.mxu0 %v581_v0 }
  0x3c   :  { %565 = vmatpush3.bf16.xpose.msk.msra.mxu0 %vm640_vm1, %v563_v33 }
  0x43   :  { %510 = vmatmul.mubr.msk.f32.vlgmr.msra.gmra.mrb[0].mxu0 %vm65_vm0, %v44_v34 }
  0x44   :  { %512 = vmatprep.mubr.msk.f32.mxu0 %vm582_vm2, %v583_v4 }
  0x47   :  { %513 = vmatmul.mubr.msk.f32.gmra.mrb[2].mxu0 %vm65_vm0, %v45_v35 }
  0x48   :  { %515 = vmatprep.mubr.msk.f32.mxu0 %vm582_vm2, %v583_v4 }
  0x4b   :  { %516 = vmatmul.mubr.msk.f32.gmra.mrb[4].mxu0 %vm65_vm0, %v46_v36 }
  0x82   :  { %v53_v38 = vpop.permute.xlu0 %52 }
  0x83   :  { %v63_v48 = vpop.permute.xlu1 %62 }
  0x86   :  { %v58_v42 = vpop.permute.xlu0 %57 }
  0x87   :  { %v213_v57 = vpop.permute.xlu1 %212 }
  0x8a   :  { %v218_v55 = vpop.permute.xlu0 %217 }
  0x8b   :  { %v313_v3 = vpop.permute.xlu1 %312 }
 0x116   :  { %v189_v39 = vpop.f32.mrb[0].mxu0 }
 0x117   :  { %v511_v40 = vpop.f32.mrb[1].mxu0  ;;  %v190_v41 = vadd.f32 %v189_v39, %v53_v38 }
 0x119   :  { %v203_v46 = vmax.f32 %v190_v41, 0.0 }
 0x11a   :  { %v194_v43 = vpop.f32.mrb[2].mxu0 }
 0x11b   :  { %v195_v44 = vadd.f32 %v194_v43, %v58_v42  ;;  %v514_v45 = vpop.f32.mrb[3].mxu0 }
 0x11d   :  { %v204_v47 = vmax.f32 %v195_v44, 0.0 }
 0x11e   :  { %v199_v49 = vpop.f32.mrb[4].mxu0 }
 0x11f   :  { %v200_v50 = vadd.f32 %v199_v49, %v63_v48  ;;  %v517_v51 = vpop.f32.mrb[5].mxu0  ;;  %v566_v52 = vpack.c.bf16 %v204_v47, %v203_v46 }
 0x121   :  { %v205_v53 = vmax.f32 %v200_v50, 0.0  ;;  %567 = vmatprep.subr.bf16.mxu1 %v566_v52 }
 0x122   :  { %569 = vmatpush3.bf16.msra.mxu1 %v566_v52 }
 0x123   :  { %522 = vmatprep.subr.msk.mxu1 %vm227_vm4, %v205_v53 }
 0x126   :  { %523 = vmatpush3.msk.msra.mxu1 %vm227_vm4, %v205_v53 }
 0x127   :  { %525 = vmatmul.mubr.msk.f32.vlgmr.msra.gmra.mrb[0].mxu1 %vm220_vm3, %v207_v54  ;;  %570 = vmatprep.subr.bf16.mxu1 %v581_v0  ;;  %v308_v0 = vld [vmem:[%s774_s5] sm:$0xff] }
 0x128   :  { %531 = vmatprep.mubr.msk.f32.mxu1 %vm582_vm2, %v583_v4 }
 0x1fa   :  { %v526_v56 = vpop.f32.mrb[0].mxu1 }
 0x1fb   :  { %v303_v58 = vadd.f32 %v526_v56, %v218_v55  ;;  %v297_v59 = vpop.f32.mrb[1].mxu1 }
 0x1fc   :  { %v298_v60 = vadd.f32 %v297_v59, %v213_v57 }
 0x1fd   :  { %v307_v61 = vmax.f32 %v303_v58, 0.0 }
 0x1fe   :  { %v306_v62 = vmax.f32 %v298_v60, 0.0 }
 0x200   :  { %v571_v63 = vpack.c.bf16 %v307_v61, %v306_v62 }
 0x202   :  { %573 = vmatpush3.bf16.msk.msra.mxu1 %vm572_vm7, %v571_v63 }
 0x205   :  { %532 = vmatmul.mubr.msk.f32.vlgmr.msra.gmra.mrb[2].mxu1 %vm315_vm8, %v308_v0 }
 0x2d8   :  { %v389_v4 = vpop.f32.mrb[2].mxu1 }
 0x2d9   :  { %v390_v5 = vadd.f32 %v389_v4, %v313_v3  ;;  %v533_v6 = vpop.f32.mrb[3].mxu1 }
 0x2db   :  { %393 = vst [vmem:[%s775_s7] sm:$0xff] %v390_v5  ;;  %v402_v7 = vsel %vm401_vm9, %v390_v5, 0.0 }
 0x2dc   :  { %403 = vadd.xlane.f32.xlu0 %v402_v7 }
 0x369   :  { %v404_v8 = vpop.xlane.xlu0 %403 }
 0x36a   :  { %v410_v9 = vmul.f32 0.125, %v404_v8  ;;  %416 = vst [vmem:[%s776_s8] sm:$0xff] %v404_v8 }
 0x36c   :  { %v411_v10 = vsub.f32 %v390_v5, %v410_v9 }
 0x36e   :  { %v412_v11 = vsel %vm401_vm9, %v411_v10, 0.0 }
 0x36f   :  { %v413_v12 = vmul.f32 %v412_v11, %v412_v11 }
 0x371   :  { %414 = vadd.xlane.f32.xlu1 %v413_v12 }
 0x3fe   :  { %v415_v13 = vpop.xlane.xlu1 %414 }
 0x3ff   :  { %417 = vst [vmem:[%s776_s8 + $0x8] sm:$0xff] %v415_v13 }

// kernel: autoencoder_forward.3
= control target key start
LH: loop header
LB: loop body
LE: loop exit
PB: predicated region body
PF: predicated region fallthrough
CT: control target
= control target key end

     0   :  { %vm48_vm0 = vcmask 64512   ;;  %v483_v0 = vmov 0.0   ;;  %vm484_vm1 = vmmov 0   ;;  %v485_v3 = vmov 0   ;;  %s646_s0 = inlined_call_operand.vmem [shape: f32[8,128], index: 0, kind: input, shape index: {}]   ;;  %s647_s1 = inlined_call_operand.vmem [shape: f32[21,8], index: 1, kind: input, shape index: {}]   ;;  %s648_s2 = inlined_call_operand.vmem [shape: f32[21,1], index: 2, kind: input, shape index: {}]   ;;  %s649_s4 = inlined_call_operand.vmem [shape: f32[11,1], index: 4, kind: input, shape index: {}]   ;;  %s650_s6 = inlined_call_operand.vmem [shape: f32[16,1], index: 6, kind: input, shape index: {}]   ;;  %s651_s3 = inlined_call_operand.vmem [shape: f32[11,21], index: 3, kind: input, shape index: {}]   ;;  %s652_s5 = inlined_call_operand.vmem [shape: f32[16,11], index: 5, kind: input, shape index: {}]   ;;  %s653_s7 = inlined_call_operand.vmem [shape: f32[128,16], index: 7, kind: output, shape index: {}]  }
   0x1   :  { %432 = vmatprep.subr.mxu0 %v483_v0  ;;  %v26_v1 = vld [vmem:[%s646_s0] sm:$0xff]  ;;  %434 = vmatprep.mubr.msk.f32.mxu0 %vm484_vm1, %v483_v0  ;;  %v32_v5 = vld [vmem:[%s648_s2 + $0x10] sm:$0x1f]  ;;  %v28_v6 = vld [vmem:[%s647_s1 + $0x8] sm:$0xff]  ;;  %vm155_vm2 = vcmask 171008   ;;  %vm162_vm3 = vcmask 1044480  }
   0x2   :  { %v27_v2 = vld [vmem:[%s647_s1] sm:$0xff]  ;;  %433 = vmatpush3.msra.mxu0 %v26_v1  ;;  %473 = vset.pattern.permute.xlu0 %v485_v3  ;;  %v31_v7 = vld [vmem:[%s648_s2 + $0x8] sm:$0xff]  ;;  %v29_v9 = vld [vmem:[%s647_s1 + $0x10] sm:$0x1f]  ;;  %vm257_vm4 = vcmask 89088   ;;  %vm264_vm5 = vcmask 1042432  }
   0x3   :  { %v30_v4 = vld [vmem:[%s648_s2] sm:$0xff]  ;;  %435 = vmatmul.mubr.msk.f32.vlgmr.msra.gmra.mrb[0].mxu0 %vm48_vm0, %v27_v2  ;;  %474 = vset.pattern.permute.xlu1 %v485_v3  ;;  %v144_v10 = vld [vmem:[%s649_s4 + $0x8] sm:$0x7]  ;;  %vm486_vm6 = vmmov 1   ;;  %vm387_vm8 = vcmask 130048  }
   0x4   :  { %35 = vperm.xlu0 %473, %v30_v4   ;;  %437 = vmatprep.mubr.msk.f32.mxu0 %vm484_vm1, %v483_v0  ;;  %v143_v8 = vld [vmem:[%s649_s4] sm:$0xff]  ;;  %v246_v12 = vld [vmem:[%s650_s6 + $0x8] sm:$0xff]  ;;  %vm464_vm7 = vmpackc.low %vm264_vm5, %vm486_vm6 }
   0x5   :  { %45 = vperm.xlu1 %474, %v32_v5   ;;  %v245_v11 = vld [vmem:[%s650_s6] sm:$0xff]  ;;  %v142_v30 = vld [vmem:[%s651_s3 + $0x8] sm:$0x7] }
   0x6   :  { %v141_v13 = vld [vmem:[%s651_s3] sm:$0xff]  ;;  %v244_v41 = vld [vmem:[%s652_s5 + $0x8] sm:$0xff] }
   0x7   :  { %438 = vmatmul.mubr.msk.f32.gmra.mrb[2].mxu0 %vm48_vm0, %v28_v6  ;;  %449 = vmatprep.mubr.msk.f32.mxu1 %vm155_vm2, %v141_v13  ;;  %v243_v31 = vld [vmem:[%s652_s5] sm:$0xff] }
   0x8   :  { %40 = vperm.xlu0 %473, %v31_v7   ;;  %440 = vmatprep.mubr.msk.f32.mxu0 %vm484_vm1, %v483_v0 }
   0x9   :  { %147 = vperm.xlu1 %474, %v143_v8  }
   0xb   :  { %441 = vmatmul.mubr.msk.f32.gmra.mrb[4].mxu0 %vm48_vm0, %v29_v9 }
   0xc   :  { %152 = vperm.xlu0 %473, %v144_v10  }
   0xd   :  { %249 = vperm.xlu1 %474, %v245_v11  }
  0x10   :  { %254 = vperm.xlu0 %473, %v246_v12  }
  0x83   :  { %v36_v14 = vpop.permute.xlu0 %35 }
  0x84   :  { %v46_v24 = vpop.permute.xlu1 %45 }
  0x87   :  { %v41_v18 = vpop.permute.xlu0 %40 }
  0x88   :  { %v148_v34 = vpop.permute.xlu1 %147 }
  0x8b   :  { %v153_v32 = vpop.permute.xlu0 %152 }
  0x8c   :  { %v250_v44 = vpop.permute.xlu1 %249 }
  0x8f   :  { %v255_v42 = vpop.permute.xlu0 %254 }
  0xd6   :  { %v124_v15 = vpop.f32.mrb[0].mxu0 }
  0xd7   :  { %v436_v16 = vpop.f32.mrb[1].mxu0  ;;  %v125_v17 = vadd.f32 %v124_v15, %v36_v14 }
  0xd9   :  { %v138_v22 = vmax.f32 %v125_v17, 0.0 }
  0xda   :  { %v129_v19 = vpop.f32.mrb[2].mxu0 }
  0xdb   :  { %v130_v20 = vadd.f32 %v129_v19, %v41_v18  ;;  %v439_v21 = vpop.f32.mrb[3].mxu0 }
  0xdd   :  { %v139_v23 = vmax.f32 %v130_v20, 0.0 }
  0xde   :  { %v134_v25 = vpop.f32.mrb[4].mxu0 }
  0xdf   :  { %v135_v26 = vadd.f32 %v134_v25, %v46_v24  ;;  %v442_v27 = vpop.f32.mrb[5].mxu0  ;;  %v459_v28 = vpack.c.bf16 %v139_v23, %v138_v22 }
  0xe1   :  { %v140_v29 = vmax.f32 %v135_v26, 0.0  ;;  %460 = vmatprep.subr.bf16.mxu1 %v459_v28 }
  0xe2   :  { %462 = vmatpush3.bf16.msra.mxu1 %v459_v28 }
  0xe3   :  { %447 = vmatprep.subr.msk.mxu1 %vm162_vm3, %v140_v29 }
  0xe6   :  { %448 = vmatpush3.msk.msra.mxu1 %vm162_vm3, %v140_v29 }
  0xe7   :  { %450 = vmatmul.mubr.msk.f32.vlgmr.msra.gmra.mrb[0].mxu1 %vm155_vm2, %v142_v30 }
  0xe8   :  { %456 = vmatprep.mubr.msk.f32.mxu1 %vm257_vm4, %v243_v31 }
 0x1ba   :  { %v451_v33 = vpop.f32.mrb[0].mxu1 }
 0x1bb   :  { %v238_v35 = vadd.f32 %v451_v33, %v153_v32  ;;  %v232_v36 = vpop.f32.mrb[1].mxu1 }
 0x1bc   :  { %v233_v37 = vadd.f32 %v232_v36, %v148_v34 }
 0x1bd   :  { %v242_v38 = vmax.f32 %v238_v35, 0.0 }
 0x1be   :  { %v241_v39 = vmax.f32 %v233_v37, 0.0 }
 0x1c0   :  { %v463_v40 = vpack.c.bf16 %v242_v38, %v241_v39 }
 0x1c2   :  { %465 = vmatprep.subr.msk.bf16.mxu1 %vm464_vm7, %v463_v40 }
 0x1c3   :  { %468 = vmatpush3.bf16.msk.msra.mxu1 %vm464_vm7, %v463_v40 }
 0x1c6   :  { %457 = vmatmul.mubr.msk.f32.vlgmr.msra.gmra.mrb[2].mxu1 %vm257_vm4, %v244_v41 }
 0x299   :  { %v458_v43 = vpop.f32.mrb[2].mxu1 }
 0x29a   :  { %v340_v45 = vadd.f32 %v458_v43, %v255_v42  ;;  %v334_v46 = vpop.f32.mrb[3].mxu1 }
 0x29b   :  { %v335_v47 = vadd.f32 %v334_v46, %v250_v44 }
 0x29c   :  { %v418_v48 = vmul.f32 -1.442695, %v340_v45 }
 0x29d   :  { %v417_v49 = vmul.f32 -1.442695, %v335_v47 }
 0x29e   :  { %475 = vpow2.f32 %v418_v48 }
 0x29f   :  { %477 = vpow2.f32 %v417_v49 }
 0x2a8   :  { %v476_v50 = vpop.eup %475 }
 0x2a9   :  { %v478_v51 = vpop.eup %477  ;;  %v350_v53 = vadd.f32 1.0, %v476_v50 }
 0x2aa   :  { %v349_v52 = vadd.f32 1.0, %v478_v51 }
 0x2ac   :  { %479 = vrcp.f32 %v349_v52 }
 0x2ad   :  { %481 = vrcp.f32 %v350_v53 }
 0x2b6   :  { %v480_v54 = vpop.eup %479 }
 0x2b7   :  { %355 = vxpose.xlu1.b32.start [1/2] (short) %v480_v54, 128  ;;  %v482_v55 = vpop.eup %481 }
 0x2bb   :  { %356 = vxpose.xlu1.b32.end [2/2] (short) %v482_v55, 128 }
 0x337   :  { %v371_v56 = vpop.trf.xlu1 }
 0x338   :  { %388 = vst.msk [vmem:[%s653_s7] sm:$0xff] %vm387_vm8, %v371_v56 }
 0x33b   :  { %v372_v57 = vpop.trf.xlu1 }
 0x33c   :  { %389 = vst.msk [vmem:[%s653_s7 + $0x8] sm:$0xff] %vm387_vm8, %v372_v57 }
 0x33f   :  { %v373_v58 = vpop.trf.xlu1 }
 0x340   :  { %390 = vst.msk [vmem:[%s653_s7 + $0x10] sm:$0xff] %vm387_vm8, %v373_v58 }
 0x343   :  { %v374_v59 = vpop.trf.xlu1 }
 0x344   :  { %391 = vst.msk [vmem:[%s653_s7 + $0x18] sm:$0xff] %vm387_vm8, %v374_v59 }
 0x347   :  { %v375_v60 = vpop.trf.xlu1 }
 0x348   :  { %392 = vst.msk [vmem:[%s653_s7 + $0x20] sm:$0xff] %vm387_vm8, %v375_v60 }
 0x34b   :  { %v376_v61 = vpop.trf.xlu1 }
 0x34c   :  { %393 = vst.msk [vmem:[%s653_s7 + $0x28] sm:$0xff] %vm387_vm8, %v376_v61 }
 0x34f   :  { %v377_v62 = vpop.trf.xlu1 }
 0x350   :  { %394 = vst.msk [vmem:[%s653_s7 + $0x30] sm:$0xff] %vm387_vm8, %v377_v62 }
 0x353   :  { %v378_v63 = vpop.trf.xlu1 }
 0x354   :  { %395 = vst.msk [vmem:[%s653_s7 + $0x38] sm:$0xff] %vm387_vm8, %v378_v63 }
 0x357   :  { %v379_v0 = vpop.trf.xlu1 }
 0x358   :  { %396 = vst.msk [vmem:[%s653_s7 + $0x40] sm:$0xff] %vm387_vm8, %v379_v0 }
 0x35b   :  { %v380_v1 = vpop.trf.xlu1 }
 0x35c   :  { %397 = vst.msk [vmem:[%s653_s7 + $0x48] sm:$0xff] %vm387_vm8, %v380_v1 }
 0x35f   :  { %v381_v2 = vpop.trf.xlu1 }
 0x360   :  { %398 = vst.msk [vmem:[%s653_s7 + $0x50] sm:$0xff] %vm387_vm8, %v381_v2 }
 0x363   :  { %v382_v3 = vpop.trf.xlu1 }
 0x364   :  { %399 = vst.msk [vmem:[%s653_s7 + $0x58] sm:$0xff] %vm387_vm8, %v382_v3 }
 0x367   :  { %v383_v4 = vpop.trf.xlu1 }
 0x368   :  { %400 = vst.msk [vmem:[%s653_s7 + $0x60] sm:$0xff] %vm387_vm8, %v383_v4 }
 0x36b   :  { %v384_v5 = vpop.trf.xlu1 }
 0x36c   :  { %401 = vst.msk [vmem:[%s653_s7 + $0x68] sm:$0xff] %vm387_vm8, %v384_v5 }
 0x36f   :  { %v385_v6 = vpop.trf.xlu1 }
 0x370   :  { %402 = vst.msk [vmem:[%s653_s7 + $0x70] sm:$0xff] %vm387_vm8, %v385_v6 }
 0x373   :  { %v386_v7 = vpop.trf.xlu1 }
 0x374   :  { %403 = vst.msk [vmem:[%s653_s7 + $0x78] sm:$0xff] %vm387_vm8, %v386_v7 }

</bundles_post_ra>
